<compile_context>
chip_gen: v5e
topology: v5e:2x2
jax: 0.10.0
libtpu: 0.0.40
codegen_flags: <defaults>
</compile_context>

<pallas_src>
import math
import jax
import jax.numpy as jnp
from jax.experimental import pallas as pl
from jax.experimental.pallas import tpu as pltpu

LANE = 128


def _round_up(x, m):
    return ((x + m - 1) // m) * m


def _pad2d(x, rows, cols):
    r, c = x.shape
    return jnp.pad(x, ((0, rows - r), (0, cols - c)))


# ---------------- GCN layer kernel: mean-aggregate + linear + tanh --------- #
def _gcn_layer_kernel(a_ref, h_ref, wt_ref, b_ref, o_ref, acc_ref):
    k = pl.program_id(1)

    @pl.when(k == 0)
    def _init():
        acc_ref[...] = jnp.zeros_like(acc_ref)

    # mailbox['m'].mean(dim=1)  ==  A_norm @ h   (bf16 MXU, f32 accumulation)
    acc_ref[...] += jnp.dot(a_ref[...], h_ref[...],
                            preferred_element_type=jnp.float32)

    @pl.when(k == pl.num_programs(1) - 1)
    def _finalize():
        # NodeUpdate: tanh(Linear(h)) = tanh(h @ W^T + b); epilogue in f32.
        agg = acc_ref[...].astype(jnp.bfloat16)
        lin = jnp.dot(agg, wt_ref[...],
                      preferred_element_type=jnp.float32) + b_ref[...]
        o_ref[...] = jnp.tanh(lin).astype(o_ref.dtype)


def gcn_layer(a_norm, h, w_t, b, *, tile_m=128, tile_k=128,
              out_dtype=jnp.bfloat16):
    """One hop: tanh((A_norm @ h) @ W^T + b).  Inputs already padded/bf16."""
    n_dst, n_src = a_norm.shape
    _, d = h.shape
    assert n_dst % tile_m == 0 and n_src % tile_k == 0 and d % LANE == 0
    grid = (n_dst // tile_m, n_src // tile_k)

    # VMEM budget: double-buffered inputs/outputs + accumulator, with margin.
    # TODO(synk): on realistic sparse graphs, switch to a
    # PrefetchScalarGridSpec-driven block-sparse form (skip all-zero A tiles /
    # gather neighbor rows) instead of the dense O(N^2) adjacency.
    out_itemsize = jnp.dtype(out_dtype).itemsize
    need = (2 * (tile_m * tile_k * a_norm.dtype.itemsize     # A tile
                 + tile_k * d * h.dtype.itemsize             # h tile
                 + d * d * w_t.dtype.itemsize                # W^T
                 + 8 * d * b.dtype.itemsize                  # bias (padded)
                 + tile_m * d * out_itemsize)                 # out tile
            + tile_m * d * 4)                                 # f32 accumulator
    vmem_limit = int(max(4 * 1024 * 1024, 2 * need))

    return pl.pallas_call(
        _gcn_layer_kernel,
        out_shape=jax.ShapeDtypeStruct((n_dst, d), out_dtype),
        grid_spec=pltpu.PrefetchScalarGridSpec(
            num_scalar_prefetch=0,
            grid=grid,
            in_specs=[
                pl.BlockSpec((tile_m, tile_k), lambda i, k: (i, k)),  # A_norm
                pl.BlockSpec((tile_k, d), lambda i, k: (k, 0)),       # h
                pl.BlockSpec((d, d), lambda i, k: (0, 0)),            # W^T
                pl.BlockSpec((1, d), lambda i, k: (0, 0)),            # bias
            ],
            out_specs=pl.BlockSpec((tile_m, d), lambda i, k: (i, 0)),
            scratch_shapes=[pltpu.VMEM((tile_m, d), jnp.float32)],
        ),
        compiler_params=pltpu.CompilerParams(
            dimension_semantics=("parallel", "arbitrary"),
            vmem_limit_bytes=vmem_limit,
        ),
    )(a_norm, h, w_t, b)


# ---------------- full forward ---------------------------------------------- #
def dgl_gcn_forward(a_norm, embeddings, weights_t, biases, user_index,
                    item_index, *, tile_m=128, tile_k=128):
    n, d = embeddings.shape
    node_tile = math.lcm(tile_m, tile_k)
    n_pad = _round_up(n, node_tile)
    d_pad = _round_up(d, LANE)

    # Zero-padding keeps results exact on the real sub-matrix: padded source
    # nodes have all-zero adjacency columns and padded feature columns have
    # zero weights/bias (tanh(0)=0), so they never contaminate real entries.
    a_p = _pad2d(a_norm, n_pad, n_pad).astype(jnp.bfloat16)
    h = _pad2d(embeddings, n_pad, d_pad).astype(jnp.bfloat16)
    wts = [_pad2d(w, d_pad, d_pad).astype(jnp.bfloat16) for w in weights_t]
    bs = [_pad2d(b, 1, d_pad).astype(jnp.float32) for b in biases]

    # encode()  (F.dropout with p=0.0 -> identity)
    # TODO(synk): fusing all hops into one pallas_call needs the full [N, D]
    # hidden state resident in VMEM between hops (global sync on h); one tiled
    # pallas_call per hop keeps the layer scalable in N.
    n_hops = len(wts)
    for li, (w_t, b) in enumerate(zip(wts, bs)):
        last = (li == n_hops - 1)
        h = gcn_layer(a_p, h, w_t, b, tile_m=tile_m, tile_k=tile_k,
                      out_dtype=jnp.float32 if last else jnp.bfloat16)

    h = h[:n, :d].astype(jnp.float32)
    # forward(): gathers + dot-product score in plain JAX (tiny B*K epilogue).
    user = h[user_index]   # [B, K, D]
    item = h[item_index]   # [B, K, D]
    return jnp.sum(user * item, axis=2)   # [B, K]


if __name__ == "__main__":
    # small, DGLGCN-consistent shapes (padded internally to 128-lane tiles,
    # n_nodes chosen so the tiled reduction grid is (2, 2), not degenerate)
    num_users, num_items = 96, 96
    n_nodes = num_users + num_items          # dm.n_user + dm.n_item
    emb = 32                                 # flags_obj.embedding_size
    hop = 2                                  # flags_obj.hop
    # flags_obj.dropout = 0.0 (identity; avoids stochastic op)
    B, K = 2, 8

    key = jax.random.PRNGKey(0)
    k_emb, k_adj, k_w, k_b, k_u, k_i = jax.random.split(key, 6)

    # Parameter init (deterministic, matching __init__ shapes):
    stdv = 1.0 / math.sqrt(emb)
    embeddings = jax.random.uniform(k_emb, (n_nodes, emb), jnp.float32, -stdv, stdv)

    wkeys = jax.random.split(k_w, hop)
    bkeys = jax.random.split(k_b, hop)
    bound = 1.0 / math.sqrt(emb)
    weights_t = [jax.random.uniform(wk, (emb, emb), jnp.float32, -bound, bound)
                 for wk in wkeys]            # stored directly as W^T ([in, out])
    biases = [jax.random.uniform(bk, (1, emb), jnp.float32, -bound, bound)
              for bk in bkeys]

    # Synthetic node-flow graph: random adjacency + self loops, row-normalized
    # so each destination averages over its in-neighbors (mailbox mean).
    # TODO(synk): DGL NodeFlow sampling / layer-wise node remapping has no
    # Pallas equivalent; the sampled block structure is this dense A_norm.
    adj = (jax.random.uniform(k_adj, (n_nodes, n_nodes)) < 0.2).astype(jnp.float32)
    adj = jnp.minimum(adj + jnp.eye(n_nodes, dtype=jnp.float32), 1.0)
    a_norm = adj / jnp.sum(adj, axis=1, keepdims=True)

    user_index = jax.random.randint(k_u, (B, K), 0, num_users)
    item_index = jax.random.randint(k_i, (B, K), num_users, n_nodes)

    score = dgl_gcn_forward(a_norm, embeddings, weights_t, biases,
                            user_index, item_index)
    score = jax.block_until_ready(score)
    assert score.shape == (B, K) and score.dtype == jnp.float32

    # pure-JAX reference mirroring the bf16 operand casts (f32 accumulation)
    f32 = jnp.float32
    a_bf = a_norm.astype(jnp.bfloat16).astype(f32)
    h_ref = embeddings
    for w_t, b in zip(weights_t, biases):
        h_bf = h_ref.astype(jnp.bfloat16).astype(f32)
        w_bf = w_t.astype(jnp.bfloat16).astype(f32)
        agg = a_bf @ h_bf
        agg_bf = agg.astype(jnp.bfloat16).astype(f32)
        h_ref = jnp.tanh(agg_bf @ w_bf + b)
    ref = jnp.sum(h_ref[user_index] * h_ref[item_index], axis=2)
    assert jnp.allclose(score, ref, atol=5e-2, rtol=5e-2), \
        float(jnp.max(jnp.abs(score - ref)))

    print("KERNEL_OK")
</pallas_src>

<mosaic_0001>
module attributes {stable_mosaic.version = 11 : i64} {
  func.func @_gcn_layer_kernel(%arg0: i32, %arg1: i32, %arg2: memref<128x128xbf16, #tpu.memory_space<vmem>>, %arg3: memref<128x128xbf16, #tpu.memory_space<vmem>>, %arg4: memref<128x128xbf16, #tpu.memory_space<vmem>>, %arg5: memref<1x128xf32, #tpu.memory_space<vmem>>, %arg6: memref<128x128xbf16, #tpu.memory_space<vmem>>, %arg7: memref<128x128xf32, #tpu.memory_space<vmem>>) attributes {dimension_semantics = [#tpu.dimension_semantics<parallel>, #tpu.dimension_semantics<arbitrary>], iteration_bounds = array<i64: 2, 2>, scalar_prefetch = 0 : i64, scratch_operands = 1 : i64, tpu.core_type = #tpu.core_type<tc>, window_params = [{transform_indices = @transform_0, window_bounds = array<i64: 128, 128>}, {transform_indices = @transform_1, window_bounds = array<i64: 128, 128>}, {pipeline_mode = #tpu.pipeline_mode<synchronous>, transform_indices = @transform_2, window_bounds = array<i64: 128, 128>}, {pipeline_mode = #tpu.pipeline_mode<synchronous>, transform_indices = @transform_3, window_bounds = array<i64: 1, 128>}, {transform_indices = @transform_4, window_bounds = array<i64: 128, 128>}]} {
    %c0_i32 = arith.constant 0 : i32
    %0 = arith.cmpi eq, %arg1, %c0_i32 : i32
    %1 = arith.extui %0 : i1 to i32
    %c0_i32_0 = arith.constant 0 : i32
    %2 = arith.cmpi ne, %1, %c0_i32_0 : i32
    scf.if %2 {
      %cst_9 = arith.constant 0.000000e+00 : f32
      %12 = vector.broadcast %cst_9 : f32 to vector<128x128xf32>
      %c0_10 = arith.constant 0 : index
      %c0_11 = arith.constant 0 : index
      %13 = vector.load %arg7[%c0_10, %c0_11] : memref<128x128xf32, #tpu.memory_space<vmem>>, vector<128x128xf32>
      tpu.vector_store %arg7[%c0_10, %c0_11], %12 {strides = array<i32>} : memref<128x128xf32, #tpu.memory_space<vmem>>, vector<128x128xf32>,
    } else {
    }
    %c0 = arith.constant 0 : index
    %c0_1 = arith.constant 0 : index
    %3 = vector.load %arg7[%c0, %c0_1] : memref<128x128xf32, #tpu.memory_space<vmem>>, vector<128x128xf32>
    %c0_2 = arith.constant 0 : index
    %c0_3 = arith.constant 0 : index
    %4 = vector.load %arg2[%c0_2, %c0_3] : memref<128x128xbf16, #tpu.memory_space<vmem>>, vector<128x128xbf16>
    %c0_4 = arith.constant 0 : index
    %c0_5 = arith.constant 0 : index
    %5 = vector.load %arg3[%c0_4, %c0_5] : memref<128x128xbf16, #tpu.memory_space<vmem>>, vector<128x128xbf16>
    %cst = arith.constant dense<0.000000e+00> : vector<128x128xf32>
    %6 = tpu.matmul %4, %5, %cst {dimension_numbers = #tpu.dot_dimension_numbers<[1], [0], [0], [1], [0, 0, 1, 1], [], []>} : vector<128x128xbf16>, vector<128x128xbf16>, vector<128x128xf32> -> vector<128x128xf32>
    %7 = arith.addf %3, %6 : vector<128x128xf32>
    %c0_6 = arith.constant 0 : index
    %c0_7 = arith.constant 0 : index
    %8 = vector.load %arg7[%c0_6, %c0_7] : memref<128x128xf32, #tpu.memory_space<vmem>>, vector<128x128xf32>
    tpu.vector_store %arg7[%c0_6, %c0_7], %7 {strides = array<i32>} : memref<128x128xf32, #tpu.memory_space<vmem>>, vector<128x128xf32>,
    %c1_i32 = arith.constant 1 : i32
    %9 = arith.cmpi eq, %arg1, %c1_i32 : i32
    %10 = arith.extui %9 : i1 to i32
    %c0_i32_8 = arith.constant 0 : i32
    %11 = arith.cmpi ne, %10, %c0_i32_8 : i32
    scf.if %11 {
      %c0_9 = arith.constant 0 : index
      %c0_10 = arith.constant 0 : index
      %12 = vector.load %arg7[%c0_9, %c0_10] : memref<128x128xf32, #tpu.memory_space<vmem>>, vector<128x128xf32>
      %13 = arith.truncf %12 : vector<128x128xf32> to vector<128x128xbf16>
      %c0_11 = arith.constant 0 : index
      %c0_12 = arith.constant 0 : index
      %14 = vector.load %arg4[%c0_11, %c0_12] : memref<128x128xbf16, #tpu.memory_space<vmem>>, vector<128x128xbf16>
      %cst_13 = arith.constant dense<0.000000e+00> : vector<128x128xf32>
      %15 = tpu.matmul %13, %14, %cst_13 {dimension_numbers = #tpu.dot_dimension_numbers<[1], [0], [0], [1], [0, 0, 1, 1], [], []>} : vector<128x128xbf16>, vector<128x128xbf16>, vector<128x128xf32> -> vector<128x128xf32>
      %c0_14 = arith.constant 0 : index
      %c0_15 = arith.constant 0 : index
      %16 = vector.load %arg5[%c0_14, %c0_15] : memref<1x128xf32, #tpu.memory_space<vmem>>, vector<1x128xf32>
      %17 = vector.broadcast %16 : vector<1x128xf32> to vector<128x128xf32>
      %18 = arith.addf %15, %17 : vector<128x128xf32>
      %19 = math.tanh %18 : vector<128x128xf32>
      %20 = arith.truncf %19 : vector<128x128xf32> to vector<128x128xbf16>
      %c0_16 = arith.constant 0 : index
      %c0_17 = arith.constant 0 : index
      %21 = vector.load %arg6[%c0_16, %c0_17] : memref<128x128xbf16, #tpu.memory_space<vmem>>, vector<128x128xbf16>
      tpu.vector_store %arg6[%c0_16, %c0_17], %20 {strides = array<i32>} : memref<128x128xbf16, #tpu.memory_space<vmem>>, vector<128x128xbf16>,
    } else {
    }
    return
  }
  func.func @transform_0(%arg0: i32, %arg1: i32) -> (i32, i32) {
    %c0_i32 = arith.constant 0 : i32
    return %arg0, %arg1 : i32, i32
  }
  func.func @transform_1(%arg0: i32, %arg1: i32) -> (i32, i32) {
    %c0_i32 = arith.constant 0 : i32
    %c0_i32_0 = arith.constant 0 : i32
    return %arg1, %c0_i32 : i32, i32
  }
  func.func @transform_2(%arg0: i32, %arg1: i32) -> (i32, i32) {
    %c0_i32 = arith.constant 0 : i32
    %c0_i32_0 = arith.constant 0 : i32
    %c0_i32_1 = arith.constant 0 : i32
    return %c0_i32, %c0_i32_0 : i32, i32
  }
  func.func @transform_3(%arg0: i32, %arg1: i32) -> (i32, i32) {
    %c0_i32 = arith.constant 0 : i32
    %c0_i32_0 = arith.constant 0 : i32
    %c0_i32_1 = arith.constant 0 : i32
    return %c0_i32, %c0_i32_0 : i32, i32
  }
  func.func @transform_4(%arg0: i32, %arg1: i32) -> (i32, i32) {
    %c0_i32 = arith.constant 0 : i32
    %c0_i32_0 = arith.constant 0 : i32
    return %arg0, %c0_i32 : i32, i32
  }
}

</mosaic_0001>

<bundles_post_ra>
// kernel: tpu_custom_call.1
= control target key start
LH: loop header
LB: loop body
LE: loop exit
PB: predicated region body
PF: predicated region fallthrough
CT: control target
= control target key end

     0   :  { %s1872_s0 = inlined_call_operand.hbm [shape: bf16[256,256], index: 0, kind: input, shape index: {}]   ;;  %s1873_s1 = inlined_call_operand.hbm [shape: bf16[256,128], index: 1, kind: input, shape index: {}]   ;;  %s1874_s2 = inlined_call_operand.hbm [shape: bf16[128,128], index: 2, kind: input, shape index: {}]   ;;  %s1875_s3 = inlined_call_operand.vmem [shape: f32[1,128], index: 3, kind: input, shape index: {}]   ;;  %s1876_s4 = inlined_call_operand.hbm [shape: bf16[256,128], index: 4, kind: output, shape index: {}]  }
   0x1   :  { %1891 = sst [smem:[#allocation25_spill]] %s1872_s0 }
   0x2   :  { %1892 = sst [smem:[#allocation26_spill]] %s1874_s2 }
   0x3   :  { %1893 = sst [smem:[#allocation27_spill]] %s1875_s3 }
   0x4   :  { %1894 = sst [smem:[#allocation28_spill]] %s1876_s4 }
   0x5   :  { %9 = vsyncpa [#allocation4], 0 }
   0x6   :  { %11 = vsyncpa [#allocation4 + $0x1], 0 }
   0x7   :  { %12 = vsyncpa [#allocation7], 0 }
   0x8   :  { %14 = vsyncpa [#allocation7 + $0x1], 0 }
   0x9   :  { %15 = vsyncpa [#allocation5], 0 }
   0xa   :  { %17 = vsyncpa [#allocation5 + $0x1], 0  ;;  %s1568_s15 = smov 0   ;;  %s1570_s16 = smov 0  }
   0xb   :  { %s1572_s17 = smov 0   ;;  %s1574_s18 = smov 0  }
   0xc   :  { %s1576_s19 = smov 0   ;;  %s1578_s20 = smov 0  }
   0xd   :  { %s1580_s21 = smov 0   ;;  %s1582_s22 = smov 0  }
   0xe   :  { %s1584_s23 = smov 0   ;;  %s1586_s24 = smov 0  }
   0xf   :  { %s1588_s25 = smov 0   ;;  %s1590_s26 = smov 0  }
  0x10   :  { %s1592_s27 = smov 0   ;;  %s1594_s28 = smov 0  }
  0x11 LB: > { %1895 = sst [smem:[#allocation14_spill]] %s1482_s15  ;;  %s1635_s29 = sadd.s32 4294967295, %s1534_s28   ;;  %s1534_s28 = sphi %s1594_s28, %s23_s28   ;;  %s1530_s27 = sphi %s1592_s27, %s1940_s27   ;;  %s1526_s26 = sphi %s1590_s26, %s1939_s26   ;;  %s1522_s25 = sphi %s1588_s25, %s1938_s25   ;;  %s1518_s24 = sphi %s1586_s24, %s1937_s24   ;;  %s1514_s23 = sphi %s1584_s23, %s1926_s23   ;;  %s1510_s22 = sphi %s1582_s22, %s1936_s22   ;;  %s1506_s21 = sphi %s1580_s21, %s1935_s21   ;;  %s1502_s20 = sphi %s1578_s20, %s1934_s20   ;;  %s1498_s19 = sphi %s1576_s19, %s1933_s19   ;;  %s1494_s18 = sphi %s1574_s18, %s1932_s18   ;;  %s1490_s17 = sphi %s1572_s17, %s1924_s17   ;;  %s1486_s16 = sphi %s1570_s16, %s1931_s16   ;;  %s1482_s15 = sphi %s1568_s15, %s1930_s15  }
  0x12   : > { %1896 = sst [smem:[#allocation15_spill]] %s1490_s17  ;;  %s868_s30 = sadd.s32 4294967294, %s1534_s28  }
  0x13   : > { %1897 = sst [smem:[#allocation16_spill]] %s1514_s23  ;;  %p57_p0 = scmp.ne.s32.totalorder %s1510_s22, %s1506_s21 }
  0x14   : > { %1898 = sst [smem:[#allocation17_spill]] %s1522_s25  ;;  %p58_p1 = scmp.eq.s32.totalorder %s1635_s29, 0 }
  0x15   : > { %1899 = sst [smem:[#allocation18_spill]] %s1530_s27  ;;  %p83_p2 = scmp.ne.s32.totalorder %s1498_s19, %s1494_s18 }
  0x16   : > { %p148_p3 = scmp.ne.s32.totalorder %s1490_s17, %s1486_s16  ;;  %p1645_p4 = por %p58_p1, %p57_p0 }
  0x17   : > { %p149_p5 = scmp.eq.s32.totalorder %s1635_s29, 3  ;;  %p1652_p6 = por %p83_p2, %p58_p1 }
  0x18   : > { %p154_p7 = scmp.ne.s32.totalorder %s1486_s16, %s1482_s15  ;;  %p155_p9 = scmp.eq.s32.totalorder %s868_s30, 3 }
  0x19   : > { %p1658_p8 = por %p149_p5, %p148_p3  ;;  %p869_p10 = scmp.ge.s32.totalorder %s1534_s28, 1 }
  0x1a   : > { %p162_p11 = scmp.lt.s32.totalorder %s1534_s28, 5  ;;  %p1664_p12 = por %p155_p9, %p154_p7 }
  0x1b   : > { %s1902_s7 = scalar_select %p1658_p8, 1, 0 }
  0x1c   : > { %s1904_s8 = scalar_select %p1664_p12, 1, 0 }
  0x1d   : > { %1903 = sst [smem:[#allocation19_spill]] %s1902_s7  ;;  %p1668_p13 = pnand %p869_p10, %p162_p11 }
  0x1e   : > { %1905 = sst [smem:[#allocation20_spill]] %s1904_s8  ;;  %s1536_s13 = smov [#allocation8]  }
  0x1f   : > { %s1907_s2 = sld [smem:[#allocation26_spill]]  ;;  %p1119_p0 = pneg %p1668_p13 }
  0x20   : > { %s175_s14 = sshll.u32 %s1536_s13, 4  ;;  %s1877_s18 = smov 64   ;;  %s176_s14 = int_to_ptr.vmem [resolvable:$true] %s175_s14 }
  0x21   : > { %p1120_p2 = pnand %p1119_p0, %p58_p1  ;;  %s1879_s21 = smov 4  }
  0x22   : > { %s32_s30 = sadd.s32 1, %s1526_s26  ;;  %s35_s10 = sadd.s32 1, %s1530_s27 }
  0x23   : > { %p33_p3 = scmp.ge.s32.totalorder %s32_s30, 2  ;;  %s44_s11 = sadd.s32 1, %s1514_s23 }
  0x24   : > { %p51_p5 = scmp.ne.s32.totalorder %s1514_s23, %s1510_s22  ;;  %p52_p7 = scmp.eq.s32.totalorder %s1534_s28, 0 }
  0x25   : > { %s173_s12 = sshll.u32 %s1907_s2, 4  ;;  %s1942_s30 = smov (%p33_p3, %s32_s30), 0  ;;  %s174_s12 = int_to_ptr.hbm [resolvable:$true] %s173_s12 }
  0x26   : > { %1122 = dma.hbm_to_vmem [thread:$0]  (!%p1120_p2), %s174_s12, 1024, %s176_s14, [#allocation7], %s1877_s18, %s1877_s18, %s1879_s21  }
  0x27   : > { %1908 = sst [smem:[#allocation21_spill]] %s1942_s30  ;;  %s1944_s10 = smov (!%p33_p3, %s35_s10), %s1530_s27 }
  0x28   : > { %s1693_s13 = ssub.s32 %s1526_s26, %s1942_s30  ;;  %p1697_p9 = por %p52_p7, %p51_p5 }
  0x29   : > { %p37_p10 = scmp.ge.s32.totalorder %s1944_s10, 2  ;;  %p68_p11 = scmp.eq.s32.totalorder %s1693_s13, 0 }
  0x2a   : > { %s138_s14 = sadd.s32 1, %s1490_s17  ;;  %p1135_p0 = scmp.lt.s32.totalorder %s1534_s28, 4 }
  0x2b   : > { %s1946_s10 = smov (%p37_p10, %s1944_s10), 0  ;;  %s192_s18 = sand.u32 1, %s1514_s23  }
  0x2c   : > { %1910 = sst [smem:[#allocation22_spill]] %s1946_s10  ;;  %s987_s21 = sshll.u32 %s1530_s27, 5 }
  0x2d   : > { %s39_s2 = ssub.s32 %s1530_s27, %s1946_s10  ;;  %s872_s8 = sshll.u32 %s192_s18, 6 }
  0x2e   : > { %s41_s30 = sor.u32 %s1693_s13, %s39_s2  ;;  %p136_p2 = scmp.eq.s32.totalorder %s39_s2, 0 }
  0x2f   : > { %p42_p3 = scmp.eq.s32.totalorder %s41_s30, 0  ;;  %s201_s7 = sadd.s32 %s1526_s26, %s987_s21 }
  0x30   : > { %s1712_s15 = scalar_select %p136_p2, %s1490_s17, %s138_s14  }
  0x31   : > { %s1715_s4 = scalar_select %p42_p3, %s1514_s23, %s44_s11  }
  0x32   : > { %1911 = sst [smem:[#allocation23_spill]] %s1712_s15  ;;  %s875_s25 = sshll.u32 %s201_s7, 2 }
  0x33   : > { %1912 = sst [smem:[#allocation24_spill]] %s1715_s4  ;;  %s196_s3 = scalar_lea.vmem [#allocation3], %s872_s8 }
  0x34   : > { %s206_s10 = sshll.u32 %s196_s3, 4  ;;  %s1913_s0 = sld [smem:[#allocation25_spill]]  ;;  %s207_s10 = int_to_ptr.vmem [resolvable:$true] %s206_s10 }
  0x35   : > { %p1124_p5 = pnand %p1135_p0, %p1697_p9  ;;  %s193_s11 = scalar_lea.sflag [#allocation4], %s192_s18 }
  0x36   : > { %s1539_s4 = smov 128   ;;  %s1914_s23 = smov 4  }
  0x37   : > { %s1915_s21 = smov 64   ;;  %s216_s7 = sand.u32 1, %s1534_s28  }
  0x38   : > { %s70_s8 = sadd.s32 1, %s1502_s20  ;;  %p77_p10 = scmp.ne.s32.totalorder %s1502_s20, %s1498_s19 }
  0x39   : > { %s1734_s3 = scalar_select %p68_p11, %s1502_s20, %s70_s8  }
  0x3a   : > { %s203_s27 = scalar_lea.hbm %s1913_s0, %s875_s25  ;;  %p79_p2 = por %p77_p10, %p52_p7 }
  0x3b   : > { %s204_s14 = sshll.u32 %s203_s27, 4  ;;  %s218_s25 = sand.u32 1, %s1502_s20   ;;  %s205_s14 = int_to_ptr.hbm [resolvable:$true] %s204_s14 }
  0x3c   : > { %1126 = dma.hbm_to_vmem [thread:$0]  (!%p1124_p5), %s205_s14, 1024, %s207_s10, %s193_s11, %s1539_s4, %s1915_s21, %s1914_s23  }
  0x3d   : > { %s988_s27 = sshll.u32 %s1526_s26, 6  ;;  %s876_s12 = sshll.u32 %s218_s25, 6 }
  0x3e   : > { %s225_s18 = scalar_lea.hbm %s1873_s1, %s988_s27  ;;  %s220_s15 = scalar_lea.vmem [#allocation6], %s876_s12 }
  0x3f   : > { %s226_s0 = sshll.u32 %s225_s18, 4  ;;  %s228_s17 = sshll.u32 %s220_s15, 4  ;;  %s227_s0 = int_to_ptr.hbm [resolvable:$true] %s226_s0  ;;  %s229_s17 = int_to_ptr.vmem [resolvable:$true] %s228_s17 }
  0x40   : > { %p1127_p9 = pnand %p1135_p0, %p79_p2  ;;  %s217_s4 = scalar_lea.sflag [#allocation7], %s216_s7 }
  0x41   : > { %240 = sbr.rel (%p1668_p13) target bundleno = 518 (0x206), region = 36  ;;  %s242_s10 = sand.u32 (!%p1668_p13), 1, %s1510_s22  }
  0x42   : > { %1129 = dma.hbm_to_vmem [thread:$0]  (!%p1127_p9), %s227_s0, 1024, %s229_s17, %s217_s4, %s1915_s21, %s1915_s21, %s1914_s23  }
  0x43   : > { %s880_s13 = sshll.u32 (!%p1668_p13), %s242_s10, 6  ;;  %s243_s14 = scalar_lea.sflag (!%p1668_p13), [#allocation4], %s242_s10 }
  0x44   : > { %s1751_s11 = scalar_lea.vmem (!%p1668_p13), [#allocation3], %s880_s13 }
  0x46   : > { %1465 = dma.done.wait (%p1645_p4), %s243_s14, 1024  }
  0x47   : > { %1467 = vsyncadd (%p1645_p4), %s243_s14, 4294966272  ;;  %s252_s15 = sand.u32 1, %s1635_s29   ;;  %s254_s0 = sand.u32 1, %s1498_s19  }
  0x48   : > { %s881_s17 = sshll.u32 %s254_s0, 6  ;;  %s253_s23 = scalar_lea.sflag [#allocation7], %s252_s15 }
  0x49   : > { %s1759_s9 = scalar_lea.vmem [#allocation6], %s881_s17 }
  0x4a   : > { %1469 = dma.done.wait (%p1652_p6), %s253_s23, 1024  }
  0x4b   : > { %1471 = vsyncadd (%p1652_p6), %s253_s23, 4294966272 }
  0x4c   : > { %1473 = dma.done.wait (%p58_p1), [#allocation7], 1024  }
  0x4d   : > { %1475 = vsyncadd (%p58_p1), [#allocation7], 4294966272  ;;  %s289_s5 = sand.u32 1, %s1486_s16   ;;  %p884_p4 = scmp.ne.s32.totalorder %s1518_s24, 0 }
  0x4e   : > { %s883_s21 = sshll.u32 %s289_s5, 6 }
  0x4f   : > { %s1772_s7 = scalar_lea.vmem [#allocation9], %s883_s21  ;;  %298 = sbr.rel (%p884_p4) target bundleno = 101 (0x65), region = 52 }
  0x54   : > { %v1540_v0 = vmov 0.0  }
  0x55   : > { %299 = vst [vmem:[#allocation2 + $0x30] sm:$0xff] %v1540_v0 }
  0x56   : > { %300 = vst [vmem:[#allocation2] sm:$0xff] %v1540_v0 }
  0x57   : > { %301 = vst [vmem:[#allocation2 + $0x58] sm:$0xff] %v1540_v0 }
  0x58   : > { %302 = vst [vmem:[#allocation2 + $0x18] sm:$0xff] %v1540_v0 }
  0x59   : > { %303 = vst [vmem:[#allocation2 + $0x50] sm:$0xff] %v1540_v0 }
  0x5a   : > { %304 = vst [vmem:[#allocation2 + $0x68] sm:$0xff] %v1540_v0 }
  0x5b   : > { %305 = vst [vmem:[#allocation2 + $0x8] sm:$0xff] %v1540_v0 }
  0x5c   : > { %306 = vst [vmem:[#allocation2 + $0x48] sm:$0xff] %v1540_v0 }
  0x5d   : > { %307 = vst [vmem:[#allocation2 + $0x40] sm:$0xff] %v1540_v0 }
  0x5e   : > { %308 = vst [vmem:[#allocation2 + $0x20] sm:$0xff] %v1540_v0 }
  0x5f   : > { %309 = vst [vmem:[#allocation2 + $0x10] sm:$0xff] %v1540_v0 }
  0x60   : > { %310 = vst [vmem:[#allocation2 + $0x38] sm:$0xff] %v1540_v0 }
  0x61   : > { %311 = vst [vmem:[#allocation2 + $0x60] sm:$0xff] %v1540_v0 }
  0x62   : > { %312 = vst [vmem:[#allocation2 + $0x70] sm:$0xff] %v1540_v0 }
  0x63   : > { %313 = vst [vmem:[#allocation2 + $0x78] sm:$0xff] %v1540_v0 }
  0x64   : > { %314 = vst [vmem:[#allocation2 + $0x28] sm:$0xff] %v1540_v0 }
  0x65 PF: > { %v1004_v1 = vld [vmem:[%s1759_s9 + $0x38] sm:$0xff]  ;;  %v1003_v2 = vld [vmem:[%s1759_s9 + $0x30] sm:$0xff]  ;;  %v1002_v3 = vld [vmem:[%s1759_s9 + $0x28] sm:$0xff]  ;;  %p949_p1 = scmp.ne.s32.totalorder %s1518_s24, 1 }
  0x66   : > { %459 = vmatpush.bf16.msra.mxu0 %v1004_v1  ;;  %1061 = vmatpush.bf16.msra.mxu1 %v1004_v1  ;;  %v1001_v4 = vld [vmem:[%s1759_s9 + $0x20] sm:$0xff]  ;;  %v1000_v5 = vld [vmem:[%s1759_s9 + $0x18] sm:$0xff]  ;;  %v999_v6 = vld [vmem:[%s1759_s9 + $0x10] sm:$0xff]  ;;  %s1916_s6 = sld [smem:[#allocation27_spill]] (!%p949_p1) }
  0x67   : > { %1062 = vmatpush.bf16.msra.mxu2 %v1004_v1  ;;  %1063 = vmatpush.bf16.msra.mxu3 %v1004_v1  ;;  %v998_v7 = vld [vmem:[%s1759_s9 + $0x8] sm:$0xff]  ;;  %v997_v8 = vld [vmem:[%s1759_s9] sm:$0xff]  ;;  %v991_v10 = vld [vmem:[%s1751_s11 + $0x10] sm:$0xff] }
  0x68   : > { %v989_v9 = vld [vmem:[%s1751_s11] sm:$0xff]  ;;  %v995_v12 = vld [vmem:[%s1751_s11 + $0x30] sm:$0xff]  ;;  %v990_v13 = vld [vmem:[%s1751_s11 + $0x8] sm:$0xff] }
  0x69   : > { %v993_v11 = vld [vmem:[%s1751_s11 + $0x20] sm:$0xff]  ;;  %v992_v14 = vld [vmem:[%s1751_s11 + $0x18] sm:$0xff]  ;;  %v994_v15 = vld [vmem:[%s1751_s11 + $0x28] sm:$0xff] }
  0x6a   : > { %460 = vmatpush.bf16.msra.mxu0 %v1003_v2  ;;  %1064 = vmatpush.bf16.msra.mxu1 %v1003_v2  ;;  %v996_v16 = vld [vmem:[%s1751_s11 + $0x38] sm:$0xff]  ;;  %v315_v17 = vld [vmem:[#allocation2 + $0x30] sm:$0xff]  ;;  %v323_v23 = vld [vmem:[#allocation2 + $0x40] sm:$0xff] }
  0x6b   : > { %1065 = vmatpush.bf16.msra.mxu2 %v1003_v2  ;;  %1066 = vmatpush.bf16.msra.mxu3 %v1003_v2  ;;  %v319_v18 = vld [vmem:[#allocation2 + $0x50] sm:$0xff]  ;;  %v327_v24 = vld [vmem:[#allocation2 + $0x60] sm:$0xff]  ;;  %v320_v26 = vld [vmem:[#allocation2 + $0x68] sm:$0xff] }
  0x6c   : > { %v316_v25 = vld [vmem:[#allocation2] sm:$0xff]  ;;  %v328_v36 = vld [vmem:[#allocation2 + $0x70] sm:$0xff]  ;;  %v317_v37 = vld [vmem:[#allocation2 + $0x58] sm:$0xff] }
  0x6d   : > { %v324_v35 = vld [vmem:[#allocation2 + $0x20] sm:$0xff]  ;;  %v321_v38 = vld [vmem:[#allocation2 + $0x8] sm:$0xff]  ;;  %v325_v47 = vld [vmem:[#allocation2 + $0x10] sm:$0xff] }
  0x6e   : > { %461 = vmatpush.bf16.msra.mxu0 %v1002_v3  ;;  %1067 = vmatpush.bf16.msra.mxu1 %v1002_v3  ;;  %v329_v48 = vld [vmem:[#allocation2 + $0x78] sm:$0xff]  ;;  %v322_v50 = vld [vmem:[#allocation2 + $0x48] sm:$0xff] }
  0x6f   : > { %1068 = vmatpush.bf16.msra.mxu2 %v1002_v3  ;;  %1069 = vmatpush.bf16.msra.mxu3 %v1002_v3  ;;  %v318_v49 = vld [vmem:[#allocation2 + $0x18] sm:$0xff]  ;;  %v330_v60 = vld [vmem:[#allocation2 + $0x28] sm:$0xff] }
  0x70   : > { %v326_v59 = vld [vmem:[#allocation2 + $0x38] sm:$0xff] }
  0x72   : > { %462 = vmatpush.bf16.msra.mxu0 %v1001_v4  ;;  %1070 = vmatpush.bf16.msra.mxu1 %v1001_v4 }
  0x73   : > { %1071 = vmatpush.bf16.msra.mxu2 %v1001_v4  ;;  %1072 = vmatpush.bf16.msra.mxu3 %v1001_v4 }
  0x76   : > { %463 = vmatpush.bf16.msra.mxu0 %v1000_v5  ;;  %1073 = vmatpush.bf16.msra.mxu1 %v1000_v5 }
  0x77   : > { %1074 = vmatpush.bf16.msra.mxu2 %v1000_v5  ;;  %1075 = vmatpush.bf16.msra.mxu3 %v1000_v5 }
  0x7a   : > { %464 = vmatpush.bf16.msra.mxu0 %v999_v6  ;;  %1076 = vmatpush.bf16.msra.mxu1 %v999_v6 }
  0x7b   : > { %1077 = vmatpush.bf16.msra.mxu2 %v999_v6  ;;  %1078 = vmatpush.bf16.msra.mxu3 %v999_v6 }
  0x7e   : > { %465 = vmatpush.bf16.msra.mxu0 %v998_v7  ;;  %1079 = vmatpush.bf16.msra.mxu1 %v998_v7 }
  0x7f   : > { %1080 = vmatpush.bf16.msra.mxu2 %v998_v7  ;;  %1081 = vmatpush.bf16.msra.mxu3 %v998_v7 }
  0x82   : > { %466 = vmatpush.bf16.msra.mxu0 %v997_v8  ;;  %1082 = vmatpush.bf16.msra.mxu1 %v997_v8 }
  0x83   : > { %1083 = vmatpush.bf16.msra.mxu2 %v997_v8  ;;  %1084 = vmatpush.bf16.msra.mxu3 %v997_v8 }
  0x85   : > { %467 = vmatmul.bf16.vlgmr.msra.gmra.mxu0 %v989_v9  ;;  %477 = vmatmul.bf16.vlgmr.msra.gmra.mxu1 %v991_v10 }
  0x86   : > { %487 = vmatmul.bf16.vlgmr.msra.gmra.mxu2 %v993_v11  ;;  %497 = vmatmul.bf16.vlgmr.msra.gmra.mxu3 %v995_v12 }
  0x95   : > { %472 = vmatmul.bf16.gmra.mxu0 %v990_v13  ;;  %482 = vmatmul.bf16.gmra.mxu1 %v992_v14 }
  0x96   : > { %492 = vmatmul.bf16.gmra.mxu2 %v994_v15  ;;  %502 = vmatmul.bf16.gmra.mxu3 %v996_v16 }
 0x102   : > { %v468_v19 = vpop.f32.mrf.mxu0  ;;  %v478_v20 = vpop.f32.mrf.mxu1 }
 0x103   : > { %v508_v21 = vadd.f32 %v468_v19, %v315_v17  ;;  %v512_v22 = vadd.f32 %v478_v20, %v319_v18 }
 0x105   : > { %524 = vst [vmem:[#allocation2 + $0x30] sm:$0xff] %v508_v21 }
 0x106   : > { %528 = vst [vmem:[#allocation2 + $0x50] sm:$0xff] %v512_v22 }
 0x109   : > { %v488_v27 = vpop.f32.mrf.mxu2  ;;  %v498_v28 = vpop.f32.mrf.mxu3 }
 0x10a   : > { %v516_v29 = vadd.f32 %v488_v27, %v323_v23  ;;  %v520_v30 = vadd.f32 %v498_v28, %v327_v24  ;;  %v470_v31 = vpop.f32.mrf.mxu0  ;;  %v480_v32 = vpop.f32.mrf.mxu1 }
 0x10b   : > { %v509_v33 = vadd.f32 %v470_v31, %v316_v25  ;;  %v513_v34 = vadd.f32 %v480_v32, %v320_v26 }
 0x10c   : > { %532 = vst [vmem:[#allocation2 + $0x40] sm:$0xff] %v516_v29 }
 0x10d   : > { %536 = vst [vmem:[#allocation2 + $0x60] sm:$0xff] %v520_v30 }
 0x10e   : > { %525 = vst [vmem:[#allocation2] sm:$0xff] %v509_v33 }
 0x10f   : > { %529 = vst [vmem:[#allocation2 + $0x68] sm:$0xff] %v513_v34 }
 0x111   : > { %v490_v39 = vpop.f32.mrf.mxu2  ;;  %v500_v40 = vpop.f32.mrf.mxu3 }
 0x112   : > { %v517_v41 = vadd.f32 %v490_v39, %v324_v35  ;;  %v521_v42 = vadd.f32 %v500_v40, %v328_v36  ;;  %v473_v43 = vpop.f32.mrf.mxu0  ;;  %v483_v44 = vpop.f32.mrf.mxu1 }
 0x113   : > { %v510_v45 = vadd.f32 %v473_v43, %v317_v37  ;;  %v514_v46 = vadd.f32 %v483_v44, %v321_v38 }
 0x114   : > { %533 = vst [vmem:[#allocation2 + $0x20] sm:$0xff] %v517_v41 }
 0x115   : > { %537 = vst [vmem:[#allocation2 + $0x70] sm:$0xff] %v521_v42 }
 0x116   : > { %526 = vst [vmem:[#allocation2 + $0x58] sm:$0xff] %v510_v45 }
 0x117   : > { %530 = vst [vmem:[#allocation2 + $0x8] sm:$0xff] %v514_v46 }
 0x119   : > { %v493_v51 = vpop.f32.mrf.mxu2  ;;  %v503_v52 = vpop.f32.mrf.mxu3 }
 0x11a   : > { %v518_v53 = vadd.f32 %v493_v51, %v325_v47  ;;  %v522_v54 = vadd.f32 %v503_v52, %v329_v48  ;;  %v475_v55 = vpop.f32.mrf.mxu0  ;;  %v485_v56 = vpop.f32.mrf.mxu1 }
 0x11b   : > { %v511_v57 = vadd.f32 %v475_v55, %v318_v49  ;;  %v515_v58 = vadd.f32 %v485_v56, %v322_v50 }
 0x11c   : > { %534 = vst [vmem:[#allocation2 + $0x10] sm:$0xff] %v518_v53 }
 0x11d   : > { %538 = vst [vmem:[#allocation2 + $0x78] sm:$0xff] %v522_v54 }
 0x11e   : > { %527 = vst [vmem:[#allocation2 + $0x18] sm:$0xff] %v511_v57 }
 0x11f   : > { %531 = vst [vmem:[#allocation2 + $0x48] sm:$0xff] %v515_v58 }
 0x121   : > { %v495_v61 = vpop.f32.mrf.mxu2  ;;  %v505_v62 = vpop.f32.mrf.mxu3  ;;  %543 = sbr.rel (%p949_p1) target bundleno = 496 (0x1f0), region = 56 }
 0x122   : > { %v519_v63 = vadd.f32 %v495_v61, %v326_v59  ;;  %v523_v0 = vadd.f32 %v505_v62, %v330_v60 }
 0x124   : > { %535 = vst [vmem:[#allocation2 + $0x38] sm:$0xff] %v519_v63 }
 0x125   : > { %539 = vst [vmem:[#allocation2 + $0x28] sm:$0xff] %v523_v0 }
 0x126   : > { %v1012_v1 = vld [vmem:[#allocation8 + $0x38] sm:$0xff]  ;;  %v1011_v2 = vld [vmem:[#allocation8 + $0x30] sm:$0xff]  ;;  %v1010_v3 = vld [vmem:[#allocation8 + $0x28] sm:$0xff] }
 0x127   : > { %636 = vmatpush.bf16.msra.mxu0 %v1012_v1  ;;  %1085 = vmatpush.bf16.msra.mxu1 %v1012_v1  ;;  %v1009_v4 = vld [vmem:[#allocation8 + $0x20] sm:$0xff]  ;;  %v1008_v5 = vld [vmem:[#allocation8 + $0x18] sm:$0xff]  ;;  %v1007_v6 = vld [vmem:[#allocation8 + $0x10] sm:$0xff] }
 0x128   : > { %1086 = vmatpush.bf16.msra.mxu2 %v1012_v1  ;;  %1087 = vmatpush.bf16.msra.mxu3 %v1012_v1  ;;  %v1006_v7 = vld [vmem:[#allocation8 + $0x8] sm:$0xff]  ;;  %v1005_v8 = vld [vmem:[#allocation8] sm:$0xff]  ;;  %v544_v9 = vld [vmem:[#allocation2 + $0x30] sm:$0xff] }
 0x129   : > { %v545_v10 = vld [vmem:[#allocation2] sm:$0xff]  ;;  %v548_v11 = vld [vmem:[#allocation2 + $0x50] sm:$0xff]  ;;  %v549_v12 = vld [vmem:[#allocation2 + $0x68] sm:$0xff] }
 0x12a   : > { %v552_v13 = vld [vmem:[#allocation2 + $0x40] sm:$0xff]  ;;  %v557_v16 = vld [vmem:[#allocation2 + $0x70] sm:$0xff]  ;;  %v560_v17 = vpack.c.bf16 %v545_v10, %v544_v9  ;;  %v562_v18 = vpack.c.bf16 %v549_v12, %v548_v11  ;;  %v546_v21 = vld [vmem:[#allocation2 + $0x58] sm:$0xff] }
 0x12b   : > { %637 = vmatpush.bf16.msra.mxu0 %v1011_v2  ;;  %1088 = vmatpush.bf16.msra.mxu1 %v1011_v2  ;;  %v553_v14 = vld [vmem:[#allocation2 + $0x20] sm:$0xff]  ;;  %v547_v22 = vld [vmem:[#allocation2 + $0x18] sm:$0xff]  ;;  %v550_v23 = vld [vmem:[#allocation2 + $0x8] sm:$0xff] }
 0x12c   : > { %1089 = vmatpush.bf16.msra.mxu2 %v1011_v2  ;;  %1090 = vmatpush.bf16.msra.mxu3 %v1011_v2  ;;  %v556_v15 = vld [vmem:[#allocation2 + $0x60] sm:$0xff]  ;;  %v564_v19 = vpack.c.bf16 %v553_v14, %v552_v13  ;;  %v551_v24 = vld [vmem:[#allocation2 + $0x48] sm:$0xff]  ;;  %v554_v25 = vld [vmem:[#allocation2 + $0x10] sm:$0xff]  ;;  %v561_v29 = vpack.c.bf16 %v547_v22, %v546_v21 }
 0x12d   : > { %v566_v20 = vpack.c.bf16 %v557_v16, %v556_v15  ;;  %v555_v26 = vld [vmem:[#allocation2 + $0x38] sm:$0xff]  ;;  %v559_v28 = vld [vmem:[#allocation2 + $0x28] sm:$0xff]  ;;  %v563_v30 = vpack.c.bf16 %v551_v24, %v550_v23  ;;  %v1257_v35 = vld [vmem:[%s1916_s6] ss:$0 sm:$0xff] }
 0x12e   : > { %v558_v27 = vld [vmem:[#allocation2 + $0x78] sm:$0xff]  ;;  %v565_v31 = vpack.c.bf16 %v555_v26, %v554_v25 }
 0x12f   : > { %638 = vmatpush.bf16.msra.mxu0 %v1010_v3  ;;  %1091 = vmatpush.bf16.msra.mxu1 %v1010_v3  ;;  %v567_v32 = vpack.c.bf16 %v559_v28, %v558_v27 }
 0x130   : > { %1092 = vmatpush.bf16.msra.mxu2 %v1010_v3  ;;  %1093 = vmatpush.bf16.msra.mxu3 %v1010_v3 }
 0x133   : > { %639 = vmatpush.bf16.msra.mxu0 %v1009_v4  ;;  %1094 = vmatpush.bf16.msra.mxu1 %v1009_v4 }
 0x134   : > { %1095 = vmatpush.bf16.msra.mxu2 %v1009_v4  ;;  %1096 = vmatpush.bf16.msra.mxu3 %v1009_v4 }
 0x137   : > { %640 = vmatpush.bf16.msra.mxu0 %v1008_v5  ;;  %1097 = vmatpush.bf16.msra.mxu1 %v1008_v5 }
 0x138   : > { %1098 = vmatpush.bf16.msra.mxu2 %v1008_v5  ;;  %1099 = vmatpush.bf16.msra.mxu3 %v1008_v5 }
 0x13b   : > { %641 = vmatpush.bf16.msra.mxu0 %v1007_v6  ;;  %1100 = vmatpush.bf16.msra.mxu1 %v1007_v6 }
 0x13c   : > { %1101 = vmatpush.bf16.msra.mxu2 %v1007_v6  ;;  %1102 = vmatpush.bf16.msra.mxu3 %v1007_v6 }
 0x13f   : > { %642 = vmatpush.bf16.msra.mxu0 %v1006_v7  ;;  %1103 = vmatpush.bf16.msra.mxu1 %v1006_v7 }
 0x140   : > { %1104 = vmatpush.bf16.msra.mxu2 %v1006_v7  ;;  %1105 = vmatpush.bf16.msra.mxu3 %v1006_v7 }
 0x143   : > { %643 = vmatpush.bf16.msra.mxu0 %v1005_v8  ;;  %1106 = vmatpush.bf16.msra.mxu1 %v1005_v8 }
 0x144   : > { %1107 = vmatpush.bf16.msra.mxu2 %v1005_v8  ;;  %1108 = vmatpush.bf16.msra.mxu3 %v1005_v8 }
 0x146   : > { %644 = vmatmul.bf16.vlgmr.msra.gmra.mxu0 %v560_v17  ;;  %654 = vmatmul.bf16.vlgmr.msra.gmra.mxu1 %v562_v18 }
 0x147   : > { %664 = vmatmul.bf16.vlgmr.msra.gmra.mxu2 %v564_v19  ;;  %674 = vmatmul.bf16.vlgmr.msra.gmra.mxu3 %v566_v20 }
 0x156   : > { %649 = vmatmul.bf16.gmra.mxu0 %v561_v29  ;;  %659 = vmatmul.bf16.gmra.mxu1 %v563_v30 }
 0x157   : > { %669 = vmatmul.bf16.gmra.mxu2 %v565_v31  ;;  %679 = vmatmul.bf16.gmra.mxu3 %v567_v32 }
 0x1c3   : > { %v645_v33 = vpop.f32.mrf.mxu0  ;;  %v655_v34 = vpop.f32.mrf.mxu1 }
 0x1c4   : > { %v646_v36 = vadd.f32 %v1257_v35, %v645_v33  ;;  %v656_v37 = vadd.f32 %v1257_v35, %v655_v34 }
 0x1c6   : > { %1258 = vtanh.f32 %v646_v36 }
 0x1c7   : > { %1260 = vtanh.f32 %v656_v37 }
 0x1ca   : > { %v665_v38 = vpop.f32.mrf.mxu2  ;;  %v675_v39 = vpop.f32.mrf.mxu3 }
 0x1cb   : > { %v647_v40 = vpop.f32.mrf.mxu0  ;;  %v657_v41 = vpop.f32.mrf.mxu1  ;;  %v666_v44 = vadd.f32 %v1257_v35, %v665_v38  ;;  %v676_v45 = vadd.f32 %v1257_v35, %v675_v39 }
 0x1cc   : > { %v648_v42 = vadd.f32 %v1257_v35, %v647_v40  ;;  %v658_v43 = vadd.f32 %v1257_v35, %v657_v41  ;;  %v1259_v48 = vpop.eup %1258 }
 0x1cd   : > { %v1261_v53 = vpop.eup %1260 }
 0x1ce   : > { %1262 = vtanh.f32 %v648_v42 }
 0x1cf   : > { %1264 = vtanh.f32 %v658_v43 }
 0x1d0   : > { %1266 = vtanh.f32 %v666_v44 }
 0x1d1   : > { %1268 = vtanh.f32 %v676_v45 }
 0x1d2   : > { %v667_v46 = vpop.f32.mrf.mxu2  ;;  %v677_v47 = vpop.f32.mrf.mxu3 }
 0x1d3   : > { %v668_v49 = vadd.f32 %v1257_v35, %v667_v46  ;;  %v678_v50 = vadd.f32 %v1257_v35, %v677_v47  ;;  %v650_v51 = vpop.f32.mrf.mxu0  ;;  %v660_v52 = vpop.f32.mrf.mxu1 }
 0x1d4   : > { %v1263_v54 = vpop.eup %1262  ;;  %v651_v59 = vadd.f32 %v1257_v35, %v650_v51  ;;  %v661_v61 = vadd.f32 %v1257_v35, %v660_v52 }
 0x1d5   : > { %1270 = vtanh.f32 %v668_v49  ;;  %v1265_v55 = vpop.eup %1264  ;;  %v1017_v56 = vpack.c.bf16 %v1263_v54, %v1259_v48 }
 0x1d6   : > { %1272 = vtanh.f32 %v678_v50  ;;  %v1027_v57 = vpack.c.bf16 %v1265_v55, %v1261_v53  ;;  %v1267_v58 = vpop.eup %1266 }
 0x1d7   : > { %1018 = vst [vmem:[%s1772_s7] sm:$0xff] %v1017_v56   ;;  %v1269_v60 = vpop.eup %1268  ;;  %1274 = vtanh.f32 %v651_v59 }
 0x1d8   : > { %1055 = vst [vmem:[%s1772_s7 + $0x10] sm:$0xff] %v1027_v57   ;;  %1276 = vtanh.f32 %v661_v61 }
 0x1da   : > { %v670_v62 = vpop.f32.mrf.mxu2  ;;  %v680_v63 = vpop.f32.mrf.mxu3 }
 0x1db   : > { %v1271_v0 = vpop.eup %1270  ;;  %v652_v1 = vpop.f32.mrf.mxu0  ;;  %v671_v8 = vadd.f32 %v1257_v35, %v670_v62  ;;  %v681_v9 = vadd.f32 %v1257_v35, %v680_v63 }
 0x1dc   : > { %v662_v2 = vpop.f32.mrf.mxu1  ;;  %v1273_v3 = vpop.eup %1272  ;;  %v1037_v4 = vpack.c.bf16 %v1271_v0, %v1267_v58  ;;  %v653_v5 = vadd.f32 %v1257_v35, %v652_v1 }
 0x1dd   : > { %v663_v6 = vadd.f32 %v1257_v35, %v662_v2  ;;  %v1047_v7 = vpack.c.bf16 %v1273_v3, %v1269_v60  ;;  %v1275_v12 = vpop.eup %1274 }
 0x1de   : > { %1057 = vst [vmem:[%s1772_s7 + $0x20] sm:$0xff] %v1037_v4   ;;  %1278 = vtanh.f32 %v653_v5  ;;  %v1277_v15 = vpop.eup %1276 }
 0x1df   : > { %1059 = vst [vmem:[%s1772_s7 + $0x30] sm:$0xff] %v1047_v7   ;;  %1280 = vtanh.f32 %v663_v6 }
 0x1e0   : > { %1282 = vtanh.f32 %v671_v8 }
 0x1e1   : > { %1284 = vtanh.f32 %v681_v9 }
 0x1e2   : > { %v672_v10 = vpop.f32.mrf.mxu2  ;;  %v682_v11 = vpop.f32.mrf.mxu3 }
 0x1e3   : > { %v673_v13 = vadd.f32 %v1257_v35, %v672_v10  ;;  %v683_v14 = vadd.f32 %v1257_v35, %v682_v11 }
 0x1e4   : > { %v1279_v16 = vpop.eup %1278 }
 0x1e5   : > { %1286 = vtanh.f32 %v673_v13  ;;  %v1281_v17 = vpop.eup %1280  ;;  %v1022_v18 = vpack.c.bf16 %v1279_v16, %v1275_v12 }
 0x1e6   : > { %1288 = vtanh.f32 %v683_v14  ;;  %v1032_v19 = vpack.c.bf16 %v1281_v17, %v1277_v15  ;;  %v1283_v20 = vpop.eup %1282 }
 0x1e7   : > { %1054 = vst [vmem:[%s1772_s7 + $0x8] sm:$0xff] %v1022_v18   ;;  %v1285_v21 = vpop.eup %1284 }
 0x1e8   : > { %1056 = vst [vmem:[%s1772_s7 + $0x18] sm:$0xff] %v1032_v19  }
 0x1eb   : > { %v1287_v22 = vpop.eup %1286 }
 0x1ec   : > { %v1289_v23 = vpop.eup %1288  ;;  %v1042_v24 = vpack.c.bf16 %v1287_v22, %v1283_v20 }
 0x1ed   : > { %v1052_v25 = vpack.c.bf16 %v1289_v23, %v1285_v21 }
 0x1ee   : > { %1058 = vst [vmem:[%s1772_s7 + $0x28] sm:$0xff] %v1042_v24  }
 0x1ef   : > { %1060 = vst [vmem:[%s1772_s7 + $0x38] sm:$0xff] %v1052_v25  }
 0x1f0 PF: > { %s1917_s8 = sld [smem:[#allocation17_spill]]  ;;  %s746_s4 = sshll.u32 %s1772_s7, 4  ;;  %s747_s4 = int_to_ptr.vmem [resolvable:$true] %s746_s4 }
 0x1f1   : > { %s1919_s30 = sld [smem:[#allocation28_spill]]  ;;  %s734_s13 = scalar_lea.sflag [#allocation5], %s289_s5 }
 0x1f6   : > { %s1013_s27 = sshll.u32 %s1917_s8, 6 }
 0x1f7   : > { %s745_s18 = scalar_lea.hbm %s1919_s30, %s1013_s27  ;;  %s1400_s17 = scalar_lea.hbm %s1919_s30, 128 }
 0x1f8   : > { %s748_s10 = sshll.u32 %s745_s18, 4  ;;  %s749_s10 = int_to_ptr.hbm [resolvable:$true] %s748_s10 }
 0x1f9   : > { %s1394_s14 = sshra.s32 %s749_s10, 4  ;;  %s1395_s14 = int_to_ptr.hbm [resolvable:$true] %s1394_s14 }
 0x1fa   : > { %s1396_s11 = scalar_lea.hbm %s1395_s14, 64  ;;  %p1401_p11 = scmp.lt.s32.totalorder %s1395_s14, %s1919_s30 }
 0x1fb   : > { %p1397_p6 = scmp.ne.s32.totalorder %s1395_s14, %s1396_s11  ;;  %p1402_p0 = scmp.lt.s32.totalorder %s1400_s17, %s1396_s11 }
 0x1fd   : > { %p1398_p13 = pnand %p1397_p6, %p1658_p8  ;;  %p1403_p3 = por %p1402_p0, %p1401_p11 }
 0x1ff   : > { %p1399_p7 = pneg %p1398_p13 }
 0x201   : > { %p1404_p5 = pnand %p1403_p3, %p1399_p7 }
 0x203   : > { %1407 = shalt.err (!%p1404_p5)
}
 0x204   : > { %s1541_s5 = smov 64   ;;  %s1542_s21 = smov 4  }
 0x205   : > { %1117 = dma.vmem_to_hbm [thread:$0]  (%p1658_p8), %s747_s4, 1024, %s749_s10, %s734_s13, %s1541_s5, %s1541_s5, %s1542_s21  }
 0x206 PF: > { %s1920_s7 = sld [smem:[#allocation14_spill]]  ;;  %p1137_p10 = scmp.ge.s32.totalorder %s1534_s28, 2 }
 0x208   : > { %p1131_p2 = pnand %p1137_p10, %p1664_p12 }
 0x20a   : > { %p1132_p9 = pneg %p1131_p2 }
 0x20c   : > { %s763_s29 = sand.u32 1, %s1920_s7  }
 0x20d   : > { %s764_s6 = scalar_lea.sflag [#allocation5], %s763_s29 }
 0x20e   : > { %1477 = dma.done.wait (%p1132_p9), %s764_s6, 1024  }
 0x20f   : > { %1479 = vsyncadd (%p1132_p9), %s764_s6, 4294966272  ;;  %s23_s28 = sadd.s32 1, %s1534_s28   ;;  %s1923_s25 = sld [smem:[#allocation15_spill]] }
 0x210   : > { %p1825_p4 = scmp.ge.s32.totalorder %s23_s28, 6   ;;  %s1924_s17 = sld [smem:[#allocation23_spill]] }
 0x211   : > { %s1925_s27 = sld [smem:[#allocation16_spill]]  ;;  %s1930_s15 = smov %s1486_s16 }
 0x212   : > { %s1926_s23 = sld [smem:[#allocation24_spill]]  ;;  %s1932_s18 = smov %s1498_s19 }
 0x213   : > { %s1927_s12 = sld [smem:[#allocation18_spill]]  ;;  %s1933_s19 = smov %s1502_s20 }
 0x214   : > { %s1928_s2 = sld [smem:[#allocation21_spill]]  ;;  %s1934_s20 = smov %s1734_s3 }
 0x215   : > { %s1929_s4 = sld [smem:[#allocation22_spill]]  ;;  %s1931_s16 = smov %s1923_s25 }
 0x216   : > { %s1935_s21 = smov %s1510_s22  ;;  %s1937_s24 = smov %s1526_s26 }
 0x217   : > { %s1936_s22 = smov %s1925_s27  ;;  %22 = sbr.rel (!%p1825_p4) target bundleno = 17 (0x11), region = 106 }
 0x219   : > { %s1938_s25 = smov %s1927_s12 }
 0x21a   : > { %s1939_s26 = smov %s1928_s2 }
 0x21b   : > { %s1940_s27 = smov %s1929_s4 }
 0x21c   :  { %770 = vsyncpa [#allocation4], 1 }
 0x21d   :  { %772 = vsyncpa [#allocation4 + $0x1], 1 }
 0x21e   :  { %773 = vsyncpa [#allocation7], 1 }
 0x21f   :  { %775 = vsyncpa [#allocation7 + $0x1], 1 }
 0x220   :  { %776 = vsyncpa [#allocation5], 1 }
 0x221   :  { %778 = vsyncpa [#allocation5 + $0x1], 1 }

</bundles_post_ra>
